<compile_context>
chip_gen: v7x
topology: tpu7x:2x2x1
jax: 0.10.0
libtpu: 0.0.40
codegen_flags: <defaults>
</compile_context>

<pallas_src>
import functools

import jax
import jax.numpy as jnp
from jax import lax
from jax.experimental import pallas as pl
from jax.experimental.pallas import tpu as pltpu


def _ceil_to(x, mult):
    return ((x + mult - 1) // mult) * mult


# ----------------------------------------------------------------------------
# Kernel A: fused head
#   clogit = [ct|ht|py] @ [WctC^T;WhtC^T;WytC^T] + (b1+b2+b3)   (cols permuted)
#   -> cfeats (bf16, permuted cols) + per-row ||f||^2
#   -> maxout over halves -> (optional dropout via precomputed mask) -> fc_W0C
#      (padded to 128 lane-dense output columns)
# ----------------------------------------------------------------------------
def _gru_prob_head_kernel(*refs, use_dropout):
    if use_dropout:
        (x_ref, w_ref, b_ref, w0_ref, b0_ref, mask_ref,
         cfeats_ref, cprob_ref, sqn_ref) = refs
    else:
        (x_ref, w_ref, b_ref, w0_ref, b0_ref,
         cfeats_ref, cprob_ref, sqn_ref) = refs
        mask_ref = None

    # Single K=(D+n+m) MXU matmul (bf16 x bf16 -> f32 accumulate).
    clogit = jnp.dot(x_ref[...], w_ref[...],
                     preferred_element_type=jnp.float32) + b_ref[...]

    # Permuted-column features for the triplet loss (bf16 halves HBM traffic).
    cf_bf = clogit.astype(jnp.bfloat16)
    cfeats_ref[...] = cf_bf
    cf32 = cf_bf.astype(jnp.float32)
    # Per-row squared norms, computed directly from f (no NxN diag extraction).
    sqn_ref[...] = jnp.sum(cf32 * cf32, axis=1, keepdims=True)

    half = clogit.shape[-1] // 2
    cmax = jnp.maximum(clogit[:, :half], clogit[:, half:])   # adjacent-pair maxout

    if use_dropout:
        # Mask is pre-scaled (0 or 1/(1-p)) bf16, generated host-side with
        # jax.random (works on both real TPU and interpret mode).
        # TODO(synk): PyTorch RNG stream is not reproducible here.
        cmax = cmax * mask_ref[...].astype(jnp.float32)

    cprob_ref[...] = (jnp.dot(cmax.astype(jnp.bfloat16), w0_ref[...],
                              preferred_element_type=jnp.float32) + b0_ref[...])


def gru_prob_head(x, wall, bsum, w0p, b0p, drop_mask, *, tile_n, use_dropout):
    N_pad, Ktot = x.shape
    m = wall.shape[1]
    half = m // 2
    Kp = w0p.shape[1]
    grid = (N_pad // tile_n,)
    kernel = functools.partial(_gru_prob_head_kernel, use_dropout=use_dropout)

    in_specs = [
        pl.BlockSpec((tile_n, Ktot), lambda i: (i, 0)),   # [ct|ht|py]
        pl.BlockSpec((Ktot, m), lambda i: (0, 0)),        # stacked W (resident)
        pl.BlockSpec((1, m), lambda i: (0, 0)),           # summed bias
        pl.BlockSpec((half, Kp), lambda i: (0, 0)),       # W0C^T (padded cols)
        pl.BlockSpec((1, Kp), lambda i: (0, 0)),          # b0C (padded cols)
    ]
    inputs = [x, wall, bsum, w0p, b0p]
    if use_dropout:
        in_specs.append(pl.BlockSpec((tile_n, half), lambda i: (i, 0)))
        inputs.append(drop_mask)

    return pl.pallas_call(
        kernel,
        out_shape=(jax.ShapeDtypeStruct((N_pad, m), jnp.bfloat16),
                   jax.ShapeDtypeStruct((N_pad, Kp), jnp.float32),
                   jax.ShapeDtypeStruct((N_pad, 1), jnp.float32)),
        grid_spec=pltpu.PrefetchScalarGridSpec(
            num_scalar_prefetch=0,
            grid=grid,
            in_specs=in_specs,
            out_specs=[
                pl.BlockSpec((tile_n, m), lambda i: (i, 0)),    # cfeats (perm)
                pl.BlockSpec((tile_n, Kp), lambda i: (i, 0)),   # cprob (padded)
                pl.BlockSpec((tile_n, 1), lambda i: (i, 0)),    # ||f||^2
            ],
        ),
        compiler_params=pltpu.CompilerParams(dimension_semantics=("parallel",)),
    )(*inputs)


# ----------------------------------------------------------------------------
# Kernel B: row-tiled batch-hard mining.
#   For each anchor block (lane axis), distances against ALL rows (sublane
#   axis) via one bf16 MXU gram + the precomputed squared norms.  Hardest
#   positive / hardest negative are axis-0 reductions, written as a lane-dense
#   (2, N) output.  Padded rows carry label -1 and are excluded.
# ----------------------------------------------------------------------------
def _triplet_dist_kernel(fa_ref, ff_ref, sqc_ref, sqr_ref, ycol_ref, yrow_ref,
                         out_ref):
    gram = lax.dot_general(ff_ref[...], fa_ref[...], (((1,), (1,)), ((), ())),
                           preferred_element_type=jnp.float32)   # (N_pad, tile_r)
    d2 = sqc_ref[...] + sqr_ref[...] - 2.0 * gram
    d = jnp.sqrt(jnp.maximum(d2, 1e-12))
    pos = ycol_ref[...] == yrow_ref[...]                         # same label
    pad_row = ycol_ref[...] < 0                                  # padded rows
    dap = jnp.max(jnp.where(pos & (~pad_row), d, -jnp.inf), axis=0, keepdims=True)
    dan = jnp.min(jnp.where(pos | pad_row, jnp.inf, d), axis=0, keepdims=True)
    out_ref[0:1, :] = dap
    out_ref[1:2, :] = dan


def pairwise_hard_mining(cfeats, sq_col, sq_row, ycol, yrow, *, tile_r):
    N_pad, m = cfeats.shape
    grid = (N_pad // tile_r,)
    return pl.pallas_call(
        _triplet_dist_kernel,
        out_shape=jax.ShapeDtypeStruct((2, N_pad), jnp.float32),
        grid_spec=pltpu.PrefetchScalarGridSpec(
            num_scalar_prefetch=0,
            grid=grid,
            in_specs=[
                pl.BlockSpec((tile_r, m), lambda i: (i, 0)),   # anchor block
                pl.BlockSpec((N_pad, m), lambda i: (0, 0)),    # all rows (resident)
                pl.BlockSpec((N_pad, 1), lambda i: (0, 0)),    # ||f_j||^2 column
                pl.BlockSpec((1, tile_r), lambda i: (0, i)),   # ||f_i||^2 anchor row
                pl.BlockSpec((N_pad, 1), lambda i: (0, 0)),    # labels column
                pl.BlockSpec((1, tile_r), lambda i: (0, i)),   # anchor labels row
            ],
            out_specs=pl.BlockSpec((2, tile_r), lambda i: (0, i)),
        ),
        compiler_params=pltpu.CompilerParams(dimension_semantics=("parallel",)),
    )(cfeats, cfeats, sq_col, sq_row, ycol, yrow)


# TODO(synk): TripletLoss class is not included in the provided source; a
# standard batch-hard margin triplet loss is implemented (hardest positive
# includes the anchor itself, distance ~1e-6).
def triplet_loss_from_mined(dap, dan, margin=0.15):
    per_anchor = jnp.maximum(dap - dan + margin, 0.0)
    valid = per_anchor > 0.0
    valid_num = jnp.sum(valid.astype(jnp.float32))
    valid_sum = jnp.sum(per_anchor)
    loss = valid_sum / jnp.maximum(valid_num, 1.0)
    return loss, valid_num, valid_sum


# ----------------------------------------------------------------------------
# Full forward (mirrors Gru_prob.forward)
# ----------------------------------------------------------------------------
def gru_prob_forward(weights, ctCs, htCs, prevC, y, use_dropout, dropout_seed=0):
    B, T, D = ctCs.shape
    n = htCs.shape[-1]
    m = weights["WytC"].shape[0]
    half = m // 2
    K = weights["W0C"].shape[0]
    N = B * T

    # Row tiling: large tiles (up to 512 rows), rows padded to a multiple.
    tile_n = min(512, _ceil_to(N, 8))
    N_pad = _ceil_to(N, tile_n)

    x = jnp.concatenate([ctCs.reshape(N, D), htCs.reshape(N, n),
                         prevC.reshape(N, m)], axis=1).astype(jnp.bfloat16)
    if N_pad > N:
        x = jnp.pad(x, ((0, N_pad - N), (0, 0)))

    # Even output columns first, odd second: adjacent-pair maxout == halves-max.
    perm = jnp.concatenate([jnp.arange(0, m, 2), jnp.arange(1, m, 2)])
    wall = jnp.concatenate([weights["WctC"].T, weights["WhtC"].T,
                            weights["WytC"].T], axis=0)[:, perm].astype(jnp.bfloat16)
    bsum = (weights["bctC"] + weights["bhtC"] + weights["bytC"])[perm]
    bsum = bsum.reshape(1, m).astype(jnp.float32)

    # Pad the small-K classifier to 128 lane-dense output columns.
    Kp = _ceil_to(K, 128)
    w0p = jnp.zeros((half, Kp), jnp.bfloat16).at[:, :K].set(
        weights["W0C"].T.astype(jnp.bfloat16))
    b0p = jnp.zeros((1, Kp), jnp.float32).at[:, :K].set(weights["b0C"].reshape(1, K))

    # Host-generated, pre-scaled dropout keep-mask (0 or 1/(1-p)); values are
    # exactly representable in bf16.  Avoids the in-kernel TPU PRNG so the
    # kernel also runs under interpret mode.
    drop_p = 0.2
    if use_dropout:
        keep = jax.random.bernoulli(jax.random.PRNGKey(dropout_seed),
                                    p=1.0 - drop_p, shape=(N_pad, half))
        drop_mask = (keep.astype(jnp.float32) *
                     jnp.float32(1.0 / (1.0 - drop_p))).astype(jnp.bfloat16)
    else:
        drop_mask = None

    cfeats, cprob_p, sqn = gru_prob_head(x, wall, bsum, w0p, b0p, drop_mask,
                                         tile_n=tile_n, use_dropout=use_dropout)

    # Batch-hard mining over the permuted features (euclidean distance is
    # invariant to a column permutation -> no inverse-permute gather).
    y_flat = y.reshape(-1).astype(jnp.int32)
    if N_pad > N:
        y_flat = jnp.concatenate([y_flat, jnp.full((N_pad - N,), -1, jnp.int32)])
    ycol = y_flat.reshape(N_pad, 1)
    yrow = y_flat.reshape(1, N_pad)
    sq_col = sqn                               # (N_pad, 1)
    sq_row = sqn.reshape(1, N_pad)             # lane-oriented copy (N values)

    tile_r = 128 if (N_pad % 128 == 0 and N_pad >= 256) else N_pad
    dd = pairwise_hard_mining(cfeats, sq_col, sq_row, ycol, yrow, tile_r=tile_r)
    dap = dd[0, :N]
    dan = dd[1, :N]
    loss, valid_num, valid_sum = triplet_loss_from_mined(dap, dan, margin=0.15)

    cprob = cprob_p[:N, :K].reshape(B, T, K)
    return cprob, loss, valid_num, valid_sum


# ----------------------------------------------------------------------------
def _init_linear(key, out_dim, in_dim):
    kw, kb = jax.random.split(key)
    bound = 1.0 / float(in_dim) ** 0.5
    w = jax.random.uniform(kw, (out_dim, in_dim), jnp.float32, -bound, bound)
    b = jax.random.uniform(kb, (out_dim,), jnp.float32, -bound, bound)
    return w, b


if __name__ == "__main__":
    params = {"D": 64, "n": 64, "m": 256, "K": 32, "mre": 64, "Kre": 16}
    B, T = 2, 8

    key = jax.random.PRNGKey(0)
    k = jax.random.split(key, 10)
    WctC, bctC = _init_linear(k[0], params["m"], params["D"])
    WhtC, bhtC = _init_linear(k[1], params["m"], params["n"])
    WytC, bytC = _init_linear(k[2], params["m"], params["m"])
    W0C, b0C = _init_linear(k[3], params["K"], params["m"] // 2)
    # fc_W0P / fc_WctRe / fc_W0Re are initialized by the module but unused in forward().

    weights = dict(WctC=WctC, bctC=bctC, WhtC=WhtC, bhtC=bhtC,
                   WytC=WytC, bytC=bytC, W0C=W0C, b0C=b0C)

    ctCs = jax.random.normal(k[4], (B, T, params["D"]), jnp.float32)
    htCs = jax.random.normal(k[5], (B, T, params["n"]), jnp.float32)
    prevC = jax.random.normal(k[6], (B, T, params["m"]), jnp.float32)
    y = jax.random.randint(k[7], (B, T), 0, params["K"], dtype=jnp.int32)

    cprob, tloss, valid_num, valid_sum = gru_prob_forward(
        weights, ctCs, htCs, prevC, y, use_dropout=False)
    jax.block_until_ready((cprob, tloss, valid_num, valid_sum))

    # Pure-JAX f32 reference for the deterministic part (no dropout).  The
    # kernel uses bf16 MXU operands with f32 accumulation, so the tolerance
    # accounts for bf16 rounding of the K=384 and K=128 contractions.
    clogit_ref = (ctCs @ WctC.T + bctC) + (htCs @ WhtC.T + bhtC) + (prevC @ WytC.T + bytC)
    cmax_ref = jnp.max(clogit_ref.reshape(B, T, params["m"] // 2, 2), axis=-1)
    cprob_ref = cmax_ref @ W0C.T + b0C
    assert cprob.shape == (B, T, params["K"])
    max_err = float(jnp.max(jnp.abs(cprob - cprob_ref)))
    assert max_err < 5e-2, f"max abs error {max_err}"
    assert bool(jnp.isfinite(tloss))
    assert bool(jnp.isfinite(valid_num)) and bool(jnp.isfinite(valid_sum))

    # Exercise the dropout path as well (mask generated host-side, applied
    # inside the kernel).
    cprob_d, tloss_d, _, _ = gru_prob_forward(
        weights, ctCs, htCs, prevC, y, use_dropout=True, dropout_seed=123)
    jax.block_until_ready((cprob_d, tloss_d))
    assert bool(jnp.all(jnp.isfinite(cprob_d)))
    assert bool(jnp.isfinite(tloss_d))

    print("KERNEL_OK")
</pallas_src>

<mosaic_0001>
module attributes {stable_mosaic.version = 11 : i64} {
  func.func @_gru_prob_head_kernel(%arg0: i32, %arg1: memref<16x384xbf16, #tpu.memory_space<vmem>>, %arg2: memref<384x256xbf16, #tpu.memory_space<vmem>>, %arg3: memref<1x256xf32, #tpu.memory_space<vmem>>, %arg4: memref<128x128xbf16, #tpu.memory_space<vmem>>, %arg5: memref<1x128xf32, #tpu.memory_space<vmem>>, %arg6: memref<16x256xbf16, #tpu.memory_space<vmem>>, %arg7: memref<16x128xf32, #tpu.memory_space<vmem>>, %arg8: memref<16x1xf32, #tpu.memory_space<vmem>>) attributes {dimension_semantics = [#tpu.dimension_semantics<parallel>], iteration_bounds = array<i64: 1>, scalar_prefetch = 0 : i64, scratch_operands = 0 : i64, tpu.core_type = #tpu.core_type<tc>, window_params = [{transform_indices = @transform_0, window_bounds = array<i64: 16, 384>}, {pipeline_mode = #tpu.pipeline_mode<synchronous>, transform_indices = @transform_1, window_bounds = array<i64: 384, 256>}, {pipeline_mode = #tpu.pipeline_mode<synchronous>, transform_indices = @transform_2, window_bounds = array<i64: 1, 256>}, {pipeline_mode = #tpu.pipeline_mode<synchronous>, transform_indices = @transform_3, window_bounds = array<i64: 128, 128>}, {pipeline_mode = #tpu.pipeline_mode<synchronous>, transform_indices = @transform_4, window_bounds = array<i64: 1, 128>}, {transform_indices = @transform_5, window_bounds = array<i64: 16, 256>}, {transform_indices = @transform_6, window_bounds = array<i64: 16, 128>}, {transform_indices = @transform_7, window_bounds = array<i64: 16, 1>}]} {
    %c0 = arith.constant 0 : index
    %c0_0 = arith.constant 0 : index
    %0 = vector.load %arg1[%c0, %c0_0] : memref<16x384xbf16, #tpu.memory_space<vmem>>, vector<16x384xbf16>
    %c0_1 = arith.constant 0 : index
    %c0_2 = arith.constant 0 : index
    %1 = vector.load %arg2[%c0_1, %c0_2] : memref<384x256xbf16, #tpu.memory_space<vmem>>, vector<384x256xbf16>
    %cst = arith.constant dense<0.000000e+00> : vector<16x256xf32>
    %2 = tpu.matmul %0, %1, %cst {dimension_numbers = #tpu.dot_dimension_numbers<[1], [0], [0], [1], [0, 0, 1, 1], [], []>} : vector<16x384xbf16>, vector<384x256xbf16>, vector<16x256xf32> -> vector<16x256xf32>
    %c0_3 = arith.constant 0 : index
    %c0_4 = arith.constant 0 : index
    %3 = vector.load %arg3[%c0_3, %c0_4] : memref<1x256xf32, #tpu.memory_space<vmem>>, vector<1x256xf32>
    %4 = vector.broadcast %3 : vector<1x256xf32> to vector<16x256xf32>
    %5 = arith.addf %2, %4 : vector<16x256xf32>
    %6 = arith.truncf %5 : vector<16x256xf32> to vector<16x256xbf16>
    %c0_5 = arith.constant 0 : index
    %c0_6 = arith.constant 0 : index
    %7 = vector.load %arg6[%c0_5, %c0_6] : memref<16x256xbf16, #tpu.memory_space<vmem>>, vector<16x256xbf16>
    tpu.vector_store %arg6[%c0_5, %c0_6], %6 {strides = array<i32>} : memref<16x256xbf16, #tpu.memory_space<vmem>>, vector<16x256xbf16>,
    %8 = arith.extf %6 : vector<16x256xbf16> to vector<16x256xf32>
    %9 = arith.mulf %8, %8 : vector<16x256xf32>
    %cst_7 = arith.constant dense<0.000000e+00> : vector<16xf32>
    %10 = vector.multi_reduction <add>, %9, %cst_7 [1] : vector<16x256xf32> to vector<16xf32>
    %11 = vector.shape_cast %10 : vector<16xf32> to vector<16x1xf32>
    %c0_8 = arith.constant 0 : index
    %c0_9 = arith.constant 0 : index
    %12 = vector.load %arg8[%c0_8, %c0_9] : memref<16x1xf32, #tpu.memory_space<vmem>>, vector<16x1xf32>
    tpu.vector_store %arg8[%c0_8, %c0_9], %11 {strides = array<i32>} : memref<16x1xf32, #tpu.memory_space<vmem>>, vector<16x1xf32>,
    %13 = vector.extract_strided_slice %5 {offsets = [0, 0], sizes = [16, 128], strides = [1, 1]} : vector<16x256xf32> to vector<16x128xf32>
    %14 = vector.extract_strided_slice %5 {offsets = [0, 128], sizes = [16, 128], strides = [1, 1]} : vector<16x256xf32> to vector<16x128xf32>
    %15 = arith.maximumf %13, %14 : vector<16x128xf32>
    %16 = arith.truncf %15 : vector<16x128xf32> to vector<16x128xbf16>
    %c0_10 = arith.constant 0 : index
    %c0_11 = arith.constant 0 : index
    %17 = vector.load %arg4[%c0_10, %c0_11] : memref<128x128xbf16, #tpu.memory_space<vmem>>, vector<128x128xbf16>
    %cst_12 = arith.constant dense<0.000000e+00> : vector<16x128xf32>
    %18 = tpu.matmul %16, %17, %cst_12 {dimension_numbers = #tpu.dot_dimension_numbers<[1], [0], [0], [1], [0, 0, 1, 1], [], []>} : vector<16x128xbf16>, vector<128x128xbf16>, vector<16x128xf32> -> vector<16x128xf32>
    %c0_13 = arith.constant 0 : index
    %c0_14 = arith.constant 0 : index
    %19 = vector.load %arg5[%c0_13, %c0_14] : memref<1x128xf32, #tpu.memory_space<vmem>>, vector<1x128xf32>
    %20 = vector.broadcast %19 : vector<1x128xf32> to vector<16x128xf32>
    %21 = arith.addf %18, %20 : vector<16x128xf32>
    %c0_15 = arith.constant 0 : index
    %c0_16 = arith.constant 0 : index
    %22 = vector.load %arg7[%c0_15, %c0_16] : memref<16x128xf32, #tpu.memory_space<vmem>>, vector<16x128xf32>
    tpu.vector_store %arg7[%c0_15, %c0_16], %21 {strides = array<i32>} : memref<16x128xf32, #tpu.memory_space<vmem>>, vector<16x128xf32>,
    return
  }
  func.func @transform_0(%arg0: i32) -> (i32, i32) {
    %c0_i32 = arith.constant 0 : i32
    %c0_i32_0 = arith.constant 0 : i32
    return %arg0, %c0_i32 : i32, i32
  }
  func.func @transform_1(%arg0: i32) -> (i32, i32) {
    %c0_i32 = arith.constant 0 : i32
    %c0_i32_0 = arith.constant 0 : i32
    %c0_i32_1 = arith.constant 0 : i32
    return %c0_i32, %c0_i32_0 : i32, i32
  }
  func.func @transform_2(%arg0: i32) -> (i32, i32) {
    %c0_i32 = arith.constant 0 : i32
    %c0_i32_0 = arith.constant 0 : i32
    %c0_i32_1 = arith.constant 0 : i32
    return %c0_i32, %c0_i32_0 : i32, i32
  }
  func.func @transform_3(%arg0: i32) -> (i32, i32) {
    %c0_i32 = arith.constant 0 : i32
    %c0_i32_0 = arith.constant 0 : i32
    %c0_i32_1 = arith.constant 0 : i32
    return %c0_i32, %c0_i32_0 : i32, i32
  }
  func.func @transform_4(%arg0: i32) -> (i32, i32) {
    %c0_i32 = arith.constant 0 : i32
    %c0_i32_0 = arith.constant 0 : i32
    %c0_i32_1 = arith.constant 0 : i32
    return %c0_i32, %c0_i32_0 : i32, i32
  }
  func.func @transform_5(%arg0: i32) -> (i32, i32) {
    %c0_i32 = arith.constant 0 : i32
    %c0_i32_0 = arith.constant 0 : i32
    return %arg0, %c0_i32 : i32, i32
  }
  func.func @transform_6(%arg0: i32) -> (i32, i32) {
    %c0_i32 = arith.constant 0 : i32
    %c0_i32_0 = arith.constant 0 : i32
    return %arg0, %c0_i32 : i32, i32
  }
  func.func @transform_7(%arg0: i32) -> (i32, i32) {
    %c0_i32 = arith.constant 0 : i32
    %c0_i32_0 = arith.constant 0 : i32
    return %arg0, %c0_i32 : i32, i32
  }
}

</mosaic_0001>

<bundles_post_ra>
// kernel: tpu_custom_call.1
= control target key start
LH: loop header
LB: loop body
LE: loop exit
PB: predicated region body
PF: predicated region fallthrough
CT: control target
= control target key end

     0   :  { %13 = vsyncpa [#allocation3], 0  ;;  %s1111_s0 = inlined_call_operand.hbm [shape: bf16[16,384], index: 0, kind: input, shape index: {}]   ;;  %s1112_s1 = inlined_call_operand.hbm [shape: bf16[384,256], index: 1, kind: input, shape index: {}]   ;;  %s1113_s2 = inlined_call_operand.vmem [shape: f32[1,256], index: 2, kind: input, shape index: {}]   ;;  %s1114_s3 = inlined_call_operand.hbm [shape: bf16[128,128], index: 3, kind: input, shape index: {}]   ;;  %s1115_s4 = inlined_call_operand.vmem [shape: f32[1,128], index: 4, kind: input, shape index: {}]   ;;  %s1116_s5 = inlined_call_operand.hbm [shape: bf16[16,256], index: 5, kind: output, shape index: {0}]   ;;  %s1117_s6 = inlined_call_operand.hbm [shape: f32[16,128], index: 6, kind: output, shape index: {1}]   ;;  %s1118_s7 = inlined_call_operand.vmem [shape: f32[16,1], index: 7, kind: output, shape index: {2}]  }
   0x1   :  { %14 = vsyncpa [#allocation6], 0 }
   0x2   :  { %15 = vsyncpa [#allocation4], 0 }
   0x3   :  { %16 = vsyncpa [#allocation10], 0  ;;  %s976_s24 = smov [#allocation5]   ;;  %s858_s28 = scalar_lea.hbm %s1112_s1, 6144 }
   0x4   :  { %s34_s25 = sshll.u32 %s976_s24, 4  ;;  %p859_p0 = scmp.ne.s32.totalorder %s1112_s1, %s858_s28  ;;  %s35_s25 = int_to_ptr.vmem [resolvable:$true] %s34_s25 }
   0x5   :  { %p862_p1 = scmp.lt.u32.totalorder %s858_s28, %s1112_s1 }
   0x7   :  { %p864_p2 = pnand %p862_p1, %p859_p0 }
   0x9   :  { %867 = shalt.err (!%p864_p2)
}
   0xa   :  { %s868_s10 = scalar_lea.vmem %s35_s25, 6144  ;;  %p873_p4 = scmp.lt.s32.totalorder %s35_s25, %s35_s25 }
   0xb   :  { %p869_p3 = scmp.ne.s32.totalorder %s35_s25, %s868_s10  ;;  %p874_p5 = scmp.lt.s32.totalorder %s868_s10, %s868_s10 }
   0xd   :  { %p875_p6 = por %p874_p5, %p873_p4 }
   0xf   :  { %p876_p7 = pnand %p875_p6, %p869_p3 }
  0x11   :  { %879 = shalt.err (!%p876_p7)
}
  0x12   :  { %s977_s11 = smov 128   ;;  %s978_s12 = smov 8  }
  0x13   :  { %40 = dma.hbm_to_vmem [thread:$0]  %s1112_s1, 6144, %s35_s25, [#allocation6], %s977_s11, %s977_s11, %s978_s12  }
  0x14   :  { %s979_s15 = smov [#allocation2]   ;;  %s880_s19 = scalar_lea.hbm %s1111_s0, 384 }
  0x15   :  { %s22_s16 = sshll.u32 %s979_s15, 4  ;;  %p881_p8 = scmp.ne.s32.totalorder %s1111_s0, %s880_s19  ;;  %s23_s16 = int_to_ptr.vmem [resolvable:$true] %s22_s16 }
  0x16   :  { %p884_p9 = scmp.lt.u32.totalorder %s880_s19, %s1111_s0 }
  0x18   :  { %p886_p10 = pnand %p884_p9, %p881_p8 }
  0x1a   :  { %889 = shalt.err (!%p886_p10)
}
  0x1b   :  { %s890_s24 = scalar_lea.vmem %s23_s16, 384  ;;  %p895_p12 = scmp.lt.s32.totalorder %s23_s16, %s23_s16 }
  0x1c   :  { %p891_p11 = scmp.ne.s32.totalorder %s23_s16, %s890_s24  ;;  %p896_p13 = scmp.lt.s32.totalorder %s890_s24, %s890_s24 }
  0x1e   :  { %p897_p0 = por %p896_p13, %p895_p12 }
  0x20   :  { %p898_p1 = pnand %p897_p0, %p891_p11 }
  0x22   :  { %901 = shalt.err (!%p898_p1)
}
  0x23   :  { %s980_s1 = smov 192   ;;  %s981_s25 = smov 12  }
  0x24   :  { %28 = dma.hbm_to_vmem [thread:$0]  %s1111_s0, 384, %s23_s16, [#allocation3], %s980_s1, %s980_s1, %s981_s25  }
  0x25   :  { %s982_s28 = smov [#allocation7]   ;;  %s902_s9 = scalar_lea.hbm %s1114_s3, 1024 }
  0x26   :  { %s48_s29 = sshll.u32 %s982_s28, 4  ;;  %p903_p2 = scmp.ne.s32.totalorder %s1114_s3, %s902_s9  ;;  %s49_s29 = int_to_ptr.vmem [resolvable:$true] %s48_s29 }
  0x27   :  { %p906_p3 = scmp.lt.u32.totalorder %s902_s9, %s1114_s3 }
  0x29   :  { %p908_p4 = pnand %p906_p3, %p903_p2 }
  0x2b   :  { %911 = shalt.err (!%p908_p4)
}
  0x2c   :  { %s912_s17 = scalar_lea.vmem %s49_s29, 1024  ;;  %p917_p6 = scmp.lt.s32.totalorder %s49_s29, %s49_s29 }
  0x2d   :  { %p913_p5 = scmp.ne.s32.totalorder %s49_s29, %s912_s17  ;;  %p918_p7 = scmp.lt.s32.totalorder %s912_s17, %s912_s17 }
  0x2f   :  { %p919_p8 = por %p918_p7, %p917_p6 }
  0x31   :  { %p920_p9 = pnand %p919_p8, %p913_p5 }
  0x33   :  { %923 = shalt.err (!%p920_p9)
}
  0x34   :  { %s983_s0 = smov 64   ;;  %s984_s16 = smov 4  }
  0x35   :  { %54 = dma.hbm_to_vmem [thread:$0]  %s1114_s3, 1024, %s49_s29, [#allocation6], %s983_s0, %s983_s0, %s984_s16  }
  0x36   :  { %968 = dma.done.wait [#allocation3], 384  }
  0x37   :  { %969 = vsyncadd [#allocation3], 4294966912 }
  0x38   :  { %970 = dma.done.wait [#allocation6], 7168  }
  0x39   :  { %971 = vsyncadd [#allocation6], 4294960128  ;;  %v985_v0 = vmov 0   ;;  %v774_v1 = vld [vmem:[#allocation5 + $0x4] ss:$8 sps:$4 sm:$0xff]   ;;  %v986_v44 = vmov 0.0  }
  0x3a   :  { %462 = vmatprep.mubr.bf16.mxu1 %v985_v0  ;;  %v776_v2 = vld [vmem:[#allocation5] ss:$8 sps:$4 sm:$0xff]   ;;  %387 = vmatprep.subr.bf16.mxu0 %v774_v1  ;;  %v777_v3 = vld [vmem:[#allocation5 + $0x14] ss:$8 sps:$4 sm:$0xff]   ;;  %v779_v4 = vld [vmem:[#allocation5 + $0x10] ss:$8 sps:$4 sm:$0xff]   ;;  %v121_v1 = vlaneseq }
  0x3b   :  { %388 = vmatpush1.bf16.msra.mxu0 %v776_v2  ;;  %v780_v5 = vld [vmem:[#allocation5 + $0x24] ss:$8 sps:$4 sm:$0xff]   ;;  %v782_v6 = vld [vmem:[#allocation5 + $0x20] ss:$8 sps:$4 sm:$0xff]   ;;  %v783_v7 = vld [vmem:[#allocation5 + $0x34] ss:$8 sps:$4 sm:$0xff]  }
  0x3c   :  { %389 = vmatprep.subr.bf16.mxu0 %v777_v3  ;;  %v785_v8 = vld [vmem:[#allocation5 + $0x30] ss:$8 sps:$4 sm:$0xff]   ;;  %v798_v9 = vld [vmem:[#allocation5 + $0x104] ss:$8 sps:$4 sm:$0xff]   ;;  %v802_v11 = vld [vmem:[#allocation5 + $0x100] ss:$8 sps:$4 sm:$0xff]  }
  0x3d   :  { %v786_v10 = vld [vmem:[#allocation5 + $0x44] ss:$8 sps:$4 sm:$0xff]   ;;  %430 = vmatprep.subr.bf16.mxu1 %v798_v9  ;;  %v804_v12 = vld [vmem:[#allocation5 + $0x114] ss:$8 sps:$4 sm:$0xff]   ;;  %v788_v13 = vld [vmem:[#allocation5 + $0x40] ss:$8 sps:$4 sm:$0xff]  }
  0x3e   :  { %431 = vmatpush1.bf16.msra.mxu1 %v802_v11  ;;  %v789_v14 = vld [vmem:[#allocation5 + $0x54] ss:$8 sps:$4 sm:$0xff]   ;;  %v808_v15 = vld [vmem:[#allocation5 + $0x110] ss:$8 sps:$4 sm:$0xff]   ;;  %v810_v16 = vld [vmem:[#allocation5 + $0x124] ss:$8 sps:$4 sm:$0xff]  }
  0x3f   :  { %390 = vmatpush1.bf16.msra.mxu0 %v779_v4  ;;  %432 = vmatprep.subr.bf16.mxu1 %v804_v12  ;;  %v791_v17 = vld [vmem:[#allocation5 + $0x50] ss:$8 sps:$4 sm:$0xff]   ;;  %v814_v18 = vld [vmem:[#allocation5 + $0x120] ss:$8 sps:$4 sm:$0xff]   ;;  %v816_v19 = vld [vmem:[#allocation5 + $0x134] ss:$8 sps:$4 sm:$0xff]  }
  0x40   :  { %391 = vmatprep.subr.bf16.mxu0 %v780_v5  ;;  %v792_v20 = vld [vmem:[#allocation5 + $0x64] ss:$8 sps:$4 sm:$0xff]   ;;  %v820_v21 = vld [vmem:[#allocation5 + $0x130] ss:$8 sps:$4 sm:$0xff]   ;;  %v794_v22 = vld [vmem:[#allocation5 + $0x60] ss:$8 sps:$4 sm:$0xff]  }
  0x41   :  { %v822_v23 = vld [vmem:[#allocation5 + $0x144] ss:$8 sps:$4 sm:$0xff]   ;;  %v795_v24 = vld [vmem:[#allocation5 + $0x74] ss:$8 sps:$4 sm:$0xff]   ;;  %v797_v25 = vld [vmem:[#allocation5 + $0x70] ss:$8 sps:$4 sm:$0xff]  }
  0x42   :  { %433 = vmatpush1.bf16.msra.mxu1 %v808_v15  ;;  %v826_v26 = vld [vmem:[#allocation5 + $0x140] ss:$8 sps:$4 sm:$0xff]   ;;  %v828_v27 = vld [vmem:[#allocation5 + $0x154] ss:$8 sps:$4 sm:$0xff]   ;;  %v800_v28 = vld [vmem:[#allocation5 + $0x84] ss:$8 sps:$4 sm:$0xff]  }
  0x43   :  { %392 = vmatpush1.bf16.msra.mxu0 %v782_v6  ;;  %434 = vmatprep.subr.bf16.mxu1 %v810_v16  ;;  %v832_v29 = vld [vmem:[#allocation5 + $0x150] ss:$8 sps:$4 sm:$0xff]   ;;  %v803_v30 = vld [vmem:[#allocation5 + $0x80] ss:$8 sps:$4 sm:$0xff]   ;;  %v834_v31 = vld [vmem:[#allocation5 + $0x164] ss:$8 sps:$4 sm:$0xff]  }
  0x44   :  { %393 = vmatprep.subr.bf16.mxu0 %v783_v7  ;;  %v806_v32 = vld [vmem:[#allocation5 + $0x94] ss:$8 sps:$4 sm:$0xff]   ;;  %v809_v33 = vld [vmem:[#allocation5 + $0x90] ss:$8 sps:$4 sm:$0xff]   ;;  %v838_v35 = vld [vmem:[#allocation5 + $0x160] ss:$8 sps:$4 sm:$0xff]  }
  0x45   :  { %v848_v34 = vld [vmem:[#allocation2 + $0x4] ss:$12 sps:$4 sm:$0xff]   ;;  %v840_v36 = vld [vmem:[#allocation5 + $0x174] ss:$8 sps:$4 sm:$0xff]   ;;  %v815_v38 = vld [vmem:[#allocation5 + $0xa0] ss:$8 sps:$4 sm:$0xff]  }
  0x46   :  { %435 = vmatpush1.bf16.msra.mxu1 %v814_v18  ;;  %v812_v37 = vld [vmem:[#allocation5 + $0xa4] ss:$8 sps:$4 sm:$0xff]   ;;  %419 = vmatprep.mubr.bf16.mxu0 %v848_v34  ;;  %v844_v39 = vld [vmem:[#allocation5 + $0x170] ss:$8 sps:$4 sm:$0xff]   ;;  %v818_v40 = vld [vmem:[#allocation5 + $0xb4] ss:$8 sps:$4 sm:$0xff]  }
  0x47   :  { %394 = vmatpush1.bf16.msra.mxu0 %v785_v8  ;;  %436 = vmatprep.subr.bf16.mxu1 %v816_v19  ;;  %v849_v41 = vld [vmem:[#allocation2 + $0x8] ss:$12 sps:$4 sm:$0xff]   ;;  %v850_v42 = vld [vmem:[#allocation7] sm:$0xff]   ;;  %v851_v46 = vld [vmem:[#allocation7 + $0x8] sm:$0xff]   ;;  %vm987_vm0 = vmmov 0   ;;  %v122_v2 = vshrl.u32 %v121_v1, 7 }
  0x48   :  { %395 = vmatprep.subr.bf16.mxu0 %v786_v10  ;;  %v821_v43 = vld [vmem:[#allocation5 + $0xb0] ss:$8 sps:$4 sm:$0xff]   ;;  %v824_v45 = vld [vmem:[#allocation5 + $0xc4] ss:$8 sps:$4 sm:$0xff]   ;;  %v827_v47 = vld [vmem:[#allocation5 + $0xc0] ss:$8 sps:$4 sm:$0xff]  }
  0x49   :  { %v830_v48 = vld [vmem:[#allocation5 + $0xd4] ss:$8 sps:$4 sm:$0xff]   ;;  %v833_v50 = vld [vmem:[#allocation5 + $0xd0] ss:$8 sps:$4 sm:$0xff]   ;;  %v836_v51 = vld [vmem:[#allocation5 + $0xe4] ss:$8 sps:$4 sm:$0xff]  }
  0x4a   :  { %437 = vmatpush1.bf16.msra.mxu1 %v820_v21  ;;  %v852_v49 = vld [vmem:[#allocation7 + $0x10] sm:$0xff]   ;;  %v853_v52 = vld [vmem:[#allocation7 + $0x18] sm:$0xff]   ;;  %v839_v53 = vld [vmem:[#allocation5 + $0xe0] ss:$8 sps:$4 sm:$0xff]   ;;  %v123_v3 = vsub.s32 0, %v122_v2  ;;  %v127_v5 = vsub.s32 1, %v122_v2 }
  0x4b   :  { %396 = vmatpush1.bf16.msra.mxu0 %v788_v13  ;;  %438 = vmatprep.subr.bf16.mxu1 %v822_v23  ;;  %v842_v54 = vld [vmem:[#allocation5 + $0xf4] ss:$8 sps:$4 sm:$0xff]   ;;  %v854_v55 = vld [vmem:[#allocation7 + $0x20] sm:$0xff]   ;;  %v845_v56 = vld [vmem:[#allocation5 + $0xf0] ss:$8 sps:$4 sm:$0xff]  }
  0x4c   :  { %397 = vmatprep.subr.bf16.mxu0 %v789_v14  ;;  %v846_v57 = vld [vmem:[#allocation2] ss:$12 sps:$4 sm:$0xff]   ;;  %v857_v60 = vld [vmem:[#allocation7 + $0x38] sm:$0xff]  }
  0x4d   :  { %v855_v58 = vld [vmem:[#allocation7 + $0x28] sm:$0xff]   ;;  %v856_v59 = vld [vmem:[#allocation7 + $0x30] sm:$0xff]  }
  0x4e   :  { %439 = vmatpush1.bf16.msra.mxu1 %v826_v26  ;;  %v119_v4 = vld [vmem:[%s1113_s2] sm:$0x3]  ;;  %s988_s2 = smov [#allocation8]  }
  0x4f   :  { %398 = vmatpush1.bf16.msra.mxu0 %v791_v17  ;;  %440 = vmatprep.subr.bf16.mxu1 %v828_v27  ;;  %v124_v6 = vrot.slane %v119_v4, %v123_v3  ;;  %v128_v7 = vrot.slane %v119_v4, %v127_v5  ;;  %s626_s21 = sshll.u32 %s988_s2, 4  ;;  %s627_s21 = int_to_ptr.vmem [resolvable:$true] %s626_s21 }
  0x50   :  { %399 = vmatprep.subr.bf16.mxu0 %v792_v20  ;;  %s924_s22 = scalar_lea.vmem %s627_s21, 256  ;;  %p929_p11 = scmp.lt.s32.totalorder %s627_s21, %s627_s21 }
  0x51   :  { %p925_p10 = scmp.ne.s32.totalorder %s627_s21, %s924_s22  ;;  %p930_p12 = scmp.lt.s32.totalorder %s924_s22, %s924_s22 }
  0x52   :  { %441 = vmatpush1.bf16.msra.mxu1 %v832_v29 }
  0x53   :  { %400 = vmatpush1.bf16.msra.mxu0 %v794_v22  ;;  %442 = vmatprep.subr.bf16.mxu1 %v834_v31  ;;  %p931_p13 = por %p930_p12, %p929_p11 }
  0x54   :  { %401 = vmatprep.subr.bf16.mxu0 %v795_v24 }
  0x55   :  { %p932_p0 = pnand %p931_p13, %p925_p10 }
  0x56   :  { %443 = vmatpush1.bf16.msra.mxu1 %v838_v35 }
  0x57   :  { %402 = vmatpush1.bf16.msra.mxu0 %v797_v25  ;;  %444 = vmatprep.subr.bf16.mxu1 %v840_v36 }
  0x58   :  { %403 = vmatprep.subr.bf16.mxu0 %v800_v28 }
  0x5a   :  { %445 = vmatpush1.bf16.msra.mxu1 %v844_v39 }
  0x5b   :  { %404 = vmatpush1.bf16.msra.mxu0 %v803_v30  ;;  %732 = vmatprep.subr.bf16.mxu1 %v986_v44 }
  0x5c   :  { %405 = vmatprep.subr.bf16.mxu0 %v806_v32 }
  0x5d   :  { %463 = vmatmul.mubr.bf16.vlgmr.msra.gmra.mrb[0].mxu1 %v849_v41 }
  0x5e   :  { %733 = vmatpush3.bf16.msra.mxu1 %v850_v42  ;;  %748 = vmatprep.mubr.msk.bf16.mxu1 %vm987_vm0, %v986_v44 }
  0x5f   :  { %406 = vmatpush1.bf16.msra.mxu0 %v809_v33  ;;  %734 = vmatprep.subr.bf16.mxu1 %v986_v44 }
  0x60   :  { %407 = vmatprep.subr.bf16.mxu0 %v812_v37 }
  0x62   :  { %735 = vmatpush3.bf16.msra.mxu1 %v851_v46 }
  0x63   :  { %408 = vmatpush1.bf16.msra.mxu0 %v815_v38  ;;  %736 = vmatprep.subr.bf16.mxu1 %v986_v44 }
  0x64   :  { %409 = vmatprep.subr.bf16.mxu0 %v818_v40 }
  0x66   :  { %737 = vmatpush3.bf16.msra.mxu1 %v852_v49 }
  0x67   :  { %410 = vmatpush1.bf16.msra.mxu0 %v821_v43  ;;  %738 = vmatprep.subr.bf16.mxu1 %v986_v44 }
  0x68   :  { %411 = vmatprep.subr.bf16.mxu0 %v824_v45 }
  0x6a   :  { %739 = vmatpush3.bf16.msra.mxu1 %v853_v52 }
  0x6b   :  { %412 = vmatpush1.bf16.msra.mxu0 %v827_v47  ;;  %740 = vmatprep.subr.bf16.mxu1 %v986_v44 }
  0x6c   :  { %413 = vmatprep.subr.bf16.mxu0 %v830_v48 }
  0x6e   :  { %741 = vmatpush3.bf16.msra.mxu1 %v854_v55 }
  0x6f   :  { %414 = vmatpush1.bf16.msra.mxu0 %v833_v50  ;;  %742 = vmatprep.subr.bf16.mxu1 %v986_v44 }
  0x70   :  { %415 = vmatprep.subr.bf16.mxu0 %v836_v51 }
  0x72   :  { %743 = vmatpush3.bf16.msra.mxu1 %v855_v58 }
  0x73   :  { %416 = vmatpush1.bf16.msra.mxu0 %v839_v53  ;;  %744 = vmatprep.subr.bf16.mxu1 %v986_v44 }
  0x74   :  { %417 = vmatprep.subr.bf16.mxu0 %v842_v54 }
  0x76   :  { %745 = vmatpush3.bf16.msra.mxu1 %v856_v59 }
  0x77   :  { %418 = vmatpush1.bf16.msra.mxu0 %v845_v56  ;;  %746 = vmatprep.subr.bf16.mxu1 %v986_v44 }
  0x7a   :  { %420 = vmatmul.mubr.bf16.vlgmr.msra.gmra.mrb[0].mxu0 %v846_v57  ;;  %747 = vmatpush3.bf16.msra.mxu1 %v857_v60 }
 0x130   :  { %v464_v61 = vpop.f32.mrb[0].mxu1 }
 0x131   :  { %v466_v62 = vpop.f32.mrb[1].mxu1 }
 0x132   :  { %v468_v63 = vpop.f32.mrb[2].mxu1 }
 0x133   :  { %v470_v0 = vpop.f32.mrb[3].mxu1 }
 0x14d   :  { %v421_v8 = vpop.f32.mrb[0].mxu0 }
 0x14e   :  { %v422_v9 = vadd.f32 %v421_v8, %v124_v6  ;;  %v423_v10 = vpop.f32.mrb[1].mxu0 }
 0x14f   :  { %v424_v11 = vadd.f32 %v423_v10, %v128_v7  ;;  %v425_v12 = vpop.f32.mrb[2].mxu0 }
 0x150   :  { %v465_v13 = vadd.f32 %v464_v61, %v422_v9  ;;  %v426_v14 = vadd.f32 %v425_v12, %v124_v6  ;;  %v427_v15 = vpop.f32.mrb[3].mxu0 }
 0x151   :  { %v467_v16 = vadd.f32 %v466_v62, %v424_v11  ;;  %v428_v17 = vadd.f32 %v427_v15, %v128_v7 }
 0x152   :  { %v469_v18 = vadd.f32 %v468_v63, %v426_v14 }
 0x153   :  { %v504_v19 = vmax.f32 %v465_v13, %v467_v16  ;;  %v471_v20 = vadd.f32 %v470_v0, %v428_v17  ;;  %v721_v21 = vpack.c.bf16 %v467_v16, %v465_v13 }
 0x154   :  { %v473_v22 = vpack.c.bf16 %v469_v18, %v465_v13 }
 0x155   :  { %v505_v23 = vmax.f32 %v469_v18, %v471_v20  ;;  %v474_v24 = vpack.c.bf16 %v471_v20, %v467_v16  ;;  %v722_v25 = vpack.c.bf16 %v471_v20, %v469_v18  ;;  %485 = vst [vmem:[#allocation8] sm:$0xff] %v721_v21 }
 0x156   :  { %v487_v26 = vunpack.c.l.bf16 %v473_v22  ;;  %v489_v27 = vunpack.c.h.bf16 %v473_v22 }
 0x157   :  { %v506_v28 = vpack.c.bf16 %v505_v23, %v504_v19  ;;  %v488_v29 = vunpack.c.l.bf16 %v474_v24  ;;  %v490_v30 = vunpack.c.h.bf16 %v474_v24  ;;  %486 = vst [vmem:[#allocation8 + $0x8] sm:$0xff] %v722_v25 }
 0x158   :  { %v491_v31 = vmul.f32 %v487_v26, %v487_v26  ;;  %v493_v32 = vmul.f32 %v489_v27, %v489_v27 }
 0x159   :  { %749 = vmatmul.mubr.bf16.vlgmr.msra.gmra.mrb[4].mxu1 %v506_v28  ;;  %v492_v33 = vmul.f32 %v488_v29, %v488_v29  ;;  %v494_v34 = vmul.f32 %v490_v30, %v490_v30 }
 0x15b   :  { %v495_v35 = vadd.f32 %v492_v33, %v491_v31  ;;  %v498_v36 = vadd.f32 %v494_v34, %v493_v32 }
 0x15d   :  { %496 = vadd.xlane.f32.xlu0 %v495_v35 }
 0x161   :  { %499 = vadd.xlane.f32.xlu0 %v498_v36 }
 0x162   :  { %935 = shalt.err (!%p932_p0)
}
 0x163   :  { %s936_s1 = scalar_lea.hbm %s1116_s5, 256 }
 0x164   :  { %p937_p1 = scmp.ne.s32.totalorder %s1116_s5, %s936_s1  ;;  %p940_p2 = scmp.lt.u32.totalorder %s936_s1, %s1116_s5 }
 0x166   :  { %p942_p3 = pnand %p940_p2, %p937_p1 }
 0x168   :  { %945 = shalt.err (!%p942_p3)
}
 0x169   :  { %632 = dma.vmem_to_hbm [thread:$0]  %s627_s21, 256, %s1116_s5, [#allocation4], %s977_s11, %s977_s11, %s978_s12   ;;  %vm501_vm1 = vcmask 7168  }
 0x16a   :  { %v712_v39 = vld [vmem:[%s1115_s4] ss:$0 sm:$0xff]  ;;  %s989_s17 = smov [#allocation9]  }
 0x16b   :  { %s638_s0 = sshll.u32 %s989_s17, 4  ;;  %s639_s0 = int_to_ptr.vmem [resolvable:$true] %s638_s0 }
 0x16c   :  { %s946_s5 = scalar_lea.vmem %s639_s0, 256  ;;  %p951_p5 = scmp.lt.s32.totalorder %s639_s0, %s639_s0 }
 0x16d   :  { %p947_p4 = scmp.ne.s32.totalorder %s639_s0, %s946_s5  ;;  %p952_p6 = scmp.lt.s32.totalorder %s946_s5, %s946_s5 }
 0x16f   :  { %p953_p7 = por %p952_p6, %p951_p5 }
 0x171   :  { %p954_p8 = pnand %p953_p7, %p947_p4 }
 0x1ea   :  { %v497_v37 = vpop.xlane.xlu0 %496 }
 0x1eb   :  { %502 = vst.msk [vmem:[%s1118_s7] sm:$0xff] %vm501_vm1, %v497_v37 }
 0x1ee   :  { %v500_v38 = vpop.xlane.xlu0 %499 }
 0x1ef   :  { %503 = vst.msk [vmem:[%s1118_s7 + $0x8] sm:$0xff] %vm501_vm1, %v500_v38 }
 0x22c   :  { %v612_v40 = vpop.f32.mrb[4].mxu1 }
 0x22d   :  { %v613_v41 = vadd.f32 %v712_v39, %v612_v40  ;;  %v750_v42 = vpop.f32.mrb[5].mxu1 }
 0x22e   :  { %v615_v43 = vpop.f32.mrb[6].mxu1 }
 0x22f   :  { %619 = vst [vmem:[#allocation9] sm:$0xff] %v613_v41  ;;  %v616_v44 = vadd.f32 %v712_v39, %v615_v43  ;;  %v751_v45 = vpop.f32.mrb[7].mxu1 }
 0x231   :  { %620 = vst [vmem:[#allocation9 + $0x8] sm:$0xff] %v616_v44 }
 0x232   :  { %957 = shalt.err (!%p954_p8)
}
 0x233   :  { %s958_s16 = scalar_lea.hbm %s1117_s6, 256 }
 0x234   :  { %p959_p9 = scmp.ne.s32.totalorder %s1117_s6, %s958_s16  ;;  %p962_p10 = scmp.lt.u32.totalorder %s958_s16, %s1117_s6 }
 0x236   :  { %p964_p11 = pnand %p962_p10, %p959_p9 }
 0x238   :  { %967 = shalt.err (!%p964_p11)
}
 0x239   :  { %644 = dma.vmem_to_hbm [thread:$0]  %s639_s0, 256, %s1117_s6, [#allocation10], %s977_s11, %s977_s11, %s978_s12  }
 0x23a   :  { %972 = dma.done.wait [#allocation4], 256  }
 0x23b   :  { %973 = vsyncadd [#allocation4], 4294967040 }
 0x23c   :  { %974 = dma.done.wait [#allocation10], 256  }
 0x23d   :  { %975 = vsyncadd [#allocation10], 4294967040 }
 0x23e   :  { %655 = vsyncpa [#allocation3], 1 }
 0x23f   :  { %656 = vsyncpa [#allocation6], 1 }
 0x240   :  { %657 = vsyncpa [#allocation4], 1 }
 0x241   :  { %658 = vsyncpa [#allocation10], 1 }

</bundles_post_ra>
